<compile_context>
chip_gen: v7x
topology: tpu7x:2x2x1
jax: 0.10.0
libtpu: 0.0.40
codegen_flags: <defaults>
</compile_context>

<pallas_src>
import jax
import jax.numpy as jnp
from jax.experimental import pallas as pl
from jax.experimental.pallas import tpu as pltpu

# --- sizes (small, consistent with the module) -------------------------------
N = 64        # ntoken (number of nodes / embedding rows)
C = 8         # ninp   (in_channels)
O = 16        # nout   (out_channels)
H = 1         # heads
HO = H * O
M = 8         # meta_size
HD = 32       # hyper_size
E = 256       # number of random directed edges
NEG_SLOPE = 0.2

# selection-matrix trick below uses (k & (HO-1)) == o; guard the assumption
assert HO & (HO - 1) == 0, "HO must be a power of two (else use k % HO)"


# --- fused kernel: hypernet + per-node weights + masked edge softmax + agg ----
def metagnn_kernel(xm_ref, wf_ref, wall_ref, adj_ref, out_ref):
    # hypernetwork: f = tanh([x | meta] @ Wf)   -- (N,C+M)@(C+M,HD)
    xm = xm_ref[...]                                                      # (N, C+M)
    f = jnp.tanh(jnp.dot(xm, wf_ref[...],
                         preferred_element_type=jnp.float32))             # (N, HD)

    # ONE fused hyper matmul: [ per-node W | att_i*att_i_o | att_i*att_j_o ]
    g = jnp.dot(f, wall_ref[...], preferred_element_type=jnp.float32)     # (N, C*HO+2*HO)
    w = g[:, :C * HO]                      # (N, C*HO), col = c*HO+o (lane-tile aligned)
    ti = g[:, C * HO:C * HO + HO]          # (N, HO)  = att_i * att_i_o
    tj = g[:, C * HO + HO:]                # (N, HO)  = att_i * att_j_o (module quirk)

    x = xm[:, :C]                                                         # (N, C)

    # Per-node bmm  xp[n,o] = sum_c x[n,c] * w[n, c*HO+o], as two MXU matmuls
    # against constant 0/1 selection matrices (expand then block-sum).
    ci = jax.lax.broadcasted_iota(jnp.int32, (C, C * HO), 0)
    cj = jax.lax.broadcasted_iota(jnp.int32, (C, C * HO), 1)
    erep = jnp.logical_and(cj >= ci * HO, cj < (ci + 1) * HO).astype(jnp.float32)  # (C, C*HO)
    rj = jax.lax.broadcasted_iota(jnp.int32, (C * HO, HO), 0)
    ro = jax.lax.broadcasted_iota(jnp.int32, (C * HO, HO), 1)
    ered = ((rj & (HO - 1)) == ro).astype(jnp.float32)                    # (C*HO, HO)

    x_rep = jnp.dot(x, erep, preferred_element_type=jnp.float32)          # (N, C*HO)
    xp = jnp.dot(x_rep * w, ered, preferred_element_type=jnp.float32)     # (N, HO)

    # attention logit terms (aio/ajo already folded into ti/tj columns)
    ei = jnp.sum(xp * ti, axis=-1, keepdims=True)                         # (N, 1) per-destination
    # per-source term directly as a lane-dense (1, N) row via MXU
    ej = jax.lax.dot_general(jnp.ones((1, HO), jnp.float32), xp * tj,
                             (((1,), (1,)), ((), ())),
                             preferred_element_type=jnp.float32)          # (1, N)

    # masked row softmax; every row has a self-loop => mrow finite, and
    # exp(-1e30 - mrow) underflows to exactly 0.0 for masked entries.
    mask = adj_ref[...].astype(jnp.float32) > 0.0                         # adj is bf16 0/1
    z = ei + ej                                                           # alpha_ij logits
    z = jnp.where(z > 0, z, NEG_SLOPE * z)                                # leaky_relu
    z = jnp.where(mask, z, -1e30)
    mrow = jnp.max(z, axis=-1, keepdims=True)
    p = jnp.exp(z - mrow)                                                 # un-normalized weights
    denom = jnp.sum(p, axis=-1, keepdims=True)

    # deferred softmax normalization: aggregate first, then scale by 1/denom
    r = pl.reciprocal(denom, approx=True)
    r = r * (2.0 - denom * r)                                             # one Newton step
    out = jnp.dot(p, xp, preferred_element_type=jnp.float32) * r
    out_ref[...] = jnp.where(out > 0, out, jnp.exp(out) - 1.0)            # F.elu


# --- one-time parameter glue (off the hot path) -------------------------------
def prepare_params(wf, whw, waw, aio, ajo):
    wf_t = wf.T                                                           # (C+M, HD)
    # reorder W_hyper rows from (o*C + c) to (c*HO + o), then transpose
    wh = whw.reshape(HO, C, HD).transpose(1, 0, 2).reshape(C * HO, HD).T  # (HD, C*HO)
    wa_i = waw[:HO, :].T                                                  # (HD, HO); att_j rows never used
    w_all = jnp.concatenate([wh, wa_i * aio, wa_i * ajo], axis=1)         # (HD, C*HO + 2*HO)
    return wf_t, w_all


# --- hot-path wrapper ----------------------------------------------------------
@jax.jit
def meta_gnn_forward(x, meta, adj_mask, wf_t, w_all):
    xm = jnp.concatenate([x, meta], axis=-1)                              # (N, C+M)
    vmem = lambda: pl.BlockSpec(memory_space=pltpu.MemorySpace.VMEM)
    return pl.pallas_call(
        metagnn_kernel,
        out_shape=jax.ShapeDtypeStruct((N, HO), jnp.float32),
        in_specs=[vmem(), vmem(), vmem(), vmem()],
        out_specs=vmem(),
    )(xm, wf_t, w_all, adj_mask)
    # NOTE: if batching multiple graphs, add a leading "parallel" grid axis
    # instead of repeated calls (near-2x on v7x's 2 TensorCores).


# --- pure-JAX reference (mirrors the PyTorch forward, eval mode) --------------
def reference(x, meta, adj, wf, whw, waw, aio, ajo):
    f = jnp.tanh(jnp.concatenate([x, meta], axis=-1) @ wf.T)
    w = f @ whw.T                                   # (N, HO*C), col = o*C + c
    Wn = w.reshape(N, HO, C)
    xp = jnp.einsum('nc,noc->no', x, Wn)
    att = f @ waw.T
    att_i = att[:, :HO]
    ei = jnp.sum(xp * aio * att_i, axis=-1)
    ej = jnp.sum(xp * ajo * att_i, axis=-1)
    z = ei[:, None] + ej[None, :]
    z = jnp.where(z > 0, z, NEG_SLOPE * z)
    z = jnp.where(adj > 0, z, -jnp.inf)
    z = z - jnp.max(z, axis=-1, keepdims=True)
    p = jnp.exp(z) * adj
    alpha = p / jnp.sum(p, axis=-1, keepdims=True)
    out = alpha @ xp
    return jnp.where(out > 0, out, jnp.exp(out) - 1.0)


def xavier(key, shape, fan_in, fan_out):
    bound = (6.0 / (fan_in + fan_out)) ** 0.5
    return jax.random.uniform(key, shape, jnp.float32, -bound, bound)


if __name__ == "__main__":
    keys = jax.random.split(jax.random.PRNGKey(0), 8)

    # parameters (deterministic, xavier-uniform style)
    emb = xavier(keys[0], (N, C), C, N)                       # node_embedding.weight -> x
    wf = xavier(keys[1], (HD, C + M), C + M, HD)              # lin_f_hidden.weight
    whw = xavier(keys[2], (HO * C, HD), HD, HO * C)           # W_hyper.weight
    waw = xavier(keys[3], (2 * HO, HD), HD, 2 * HO)           # att_hyper.weight
    aio = xavier(keys[4], (1, HO), HO, 1)                     # att_i_o (flattened heads)
    ajo = xavier(keys[5], (1, HO), HO, 1)                     # att_j_o

    # inputs
    meta_k = jax.random.normal(keys[6], (N, M), jnp.float32)
    src = jax.random.randint(jax.random.fold_in(keys[7], 0), (E,), 0, N)
    dst = jax.random.randint(jax.random.fold_in(keys[7], 1), (E,), 0, N)
    adj = jnp.zeros((N, N), jnp.float32).at[dst, src].set(1.0)
    adj = adj.at[jnp.arange(N), jnp.arange(N)].set(1.0)       # remove+add self loops
    adj_mask = adj.astype(jnp.bfloat16)                       # 0/1 mask, half the bytes

    # one-time parameter preparation (not inside the per-call jit)
    wf_t, w_all = prepare_params(wf, whw, waw, aio, ajo)

    out = meta_gnn_forward(emb, meta_k, adj_mask, wf_t, w_all)
    out = jax.block_until_ready(out)

    ref = reference(emb, meta_k, adj, wf, whw, waw, aio, ajo)
    assert out.shape == (N, HO)
    assert jnp.allclose(out, ref, atol=1e-4, rtol=1e-4), float(jnp.max(jnp.abs(out - ref)))

    print("KERNEL_OK")
</pallas_src>

<mosaic_0001>
module attributes {stable_mosaic.version = 11 : i64} {
  func.func @metagnn_kernel(%arg0: memref<64x16xf32, #tpu.memory_space<vmem>>, %arg1: memref<16x32xf32, #tpu.memory_space<vmem>>, %arg2: memref<32x160xf32, #tpu.memory_space<vmem>>, %arg3: memref<64x64xbf16, #tpu.memory_space<vmem>>, %arg4: memref<64x16xf32, #tpu.memory_space<vmem>>) attributes {dimension_semantics = [], scalar_prefetch = 0 : i64, scratch_operands = 0 : i64, tpu.core_type = #tpu.core_type<tc>} {
    %c0 = arith.constant 0 : index
    %c0_0 = arith.constant 0 : index
    %0 = vector.load %arg0[%c0, %c0_0] : memref<64x16xf32, #tpu.memory_space<vmem>>, vector<64x16xf32>
    %c0_1 = arith.constant 0 : index
    %c0_2 = arith.constant 0 : index
    %1 = vector.load %arg1[%c0_1, %c0_2] : memref<16x32xf32, #tpu.memory_space<vmem>>, vector<16x32xf32>
    %cst = arith.constant dense<0.000000e+00> : vector<64x32xf32>
    %2 = tpu.matmul %0, %1, %cst {dimension_numbers = #tpu.dot_dimension_numbers<[1], [0], [0], [1], [0, 0, 1, 1], [], []>} : vector<64x16xf32>, vector<16x32xf32>, vector<64x32xf32> -> vector<64x32xf32>
    %3 = math.tanh %2 : vector<64x32xf32>
    %c0_3 = arith.constant 0 : index
    %c0_4 = arith.constant 0 : index
    %4 = vector.load %arg2[%c0_3, %c0_4] : memref<32x160xf32, #tpu.memory_space<vmem>>, vector<32x160xf32>
    %cst_5 = arith.constant dense<0.000000e+00> : vector<64x160xf32>
    %5 = tpu.matmul %3, %4, %cst_5 {dimension_numbers = #tpu.dot_dimension_numbers<[1], [0], [0], [1], [0, 0, 1, 1], [], []>} : vector<64x32xf32>, vector<32x160xf32>, vector<64x160xf32> -> vector<64x160xf32>
    %6 = vector.extract_strided_slice %5 {offsets = [0, 0], sizes = [64, 128], strides = [1, 1]} : vector<64x160xf32> to vector<64x128xf32>
    %7 = vector.extract_strided_slice %5 {offsets = [0, 128], sizes = [64, 16], strides = [1, 1]} : vector<64x160xf32> to vector<64x16xf32>
    %8 = vector.extract_strided_slice %5 {offsets = [0, 144], sizes = [64, 16], strides = [1, 1]} : vector<64x160xf32> to vector<64x16xf32>
    %9 = vector.extract_strided_slice %0 {offsets = [0, 0], sizes = [64, 8], strides = [1, 1]} : vector<64x16xf32> to vector<64x8xf32>
    %10 = tpu.iota {dimensions = array<i32: 0>} : vector<8x128xi32>
    %11 = tpu.iota {dimensions = array<i32: 1>} : vector<8x128xi32>
    %c16_i32 = arith.constant 16 : i32
    %12 = vector.broadcast %c16_i32 : i32 to vector<8x128xi32>
    %13 = arith.muli %10, %12 : vector<8x128xi32>
    %14 = arith.cmpi sge, %11, %13 : vector<8x128xi32>
    %c1_i32 = arith.constant 1 : i32
    %15 = vector.broadcast %c1_i32 : i32 to vector<8x128xi32>
    %16 = arith.addi %10, %15 : vector<8x128xi32>
    %c16_i32_6 = arith.constant 16 : i32
    %17 = vector.broadcast %c16_i32_6 : i32 to vector<8x128xi32>
    %18 = arith.muli %16, %17 : vector<8x128xi32>
    %19 = arith.cmpi slt, %11, %18 : vector<8x128xi32>
    %20 = arith.andi %14, %19 : vector<8x128xi1>
    %21 = arith.extui %20 : vector<8x128xi1> to vector<8x128xi32>
    %22 = arith.sitofp %21 : vector<8x128xi32> to vector<8x128xf32>
    %23 = tpu.iota {dimensions = array<i32: 0>} : vector<128x16xi32>
    %24 = tpu.iota {dimensions = array<i32: 1>} : vector<128x16xi32>
    %c15_i32 = arith.constant 15 : i32
    %25 = vector.broadcast %c15_i32 : i32 to vector<128x16xi32>
    %26 = arith.andi %23, %25 : vector<128x16xi32>
    %27 = arith.cmpi eq, %26, %24 : vector<128x16xi32>
    %28 = arith.extui %27 : vector<128x16xi1> to vector<128x16xi32>
    %29 = arith.sitofp %28 : vector<128x16xi32> to vector<128x16xf32>
    %cst_7 = arith.constant dense<0.000000e+00> : vector<64x128xf32>
    %30 = tpu.matmul %9, %22, %cst_7 {dimension_numbers = #tpu.dot_dimension_numbers<[1], [0], [0], [1], [0, 0, 1, 1], [], []>} : vector<64x8xf32>, vector<8x128xf32>, vector<64x128xf32> -> vector<64x128xf32>
    %31 = arith.mulf %30, %6 : vector<64x128xf32>
    %cst_8 = arith.constant dense<0.000000e+00> : vector<64x16xf32>
    %32 = tpu.matmul %31, %29, %cst_8 {dimension_numbers = #tpu.dot_dimension_numbers<[1], [0], [0], [1], [0, 0, 1, 1], [], []>} : vector<64x128xf32>, vector<128x16xf32>, vector<64x16xf32> -> vector<64x16xf32>
    %33 = arith.mulf %32, %7 : vector<64x16xf32>
    %cst_9 = arith.constant dense<0.000000e+00> : vector<64xf32>
    %34 = vector.multi_reduction <add>, %33, %cst_9 [1] : vector<64x16xf32> to vector<64xf32>
    %35 = vector.shape_cast %34 : vector<64xf32> to vector<64x1xf32>
    %cst_10 = arith.constant 1.000000e+00 : f32
    %36 = vector.broadcast %cst_10 : f32 to vector<1x16xf32>
    %37 = arith.mulf %32, %8 : vector<64x16xf32>
    %cst_11 = arith.constant dense<0.000000e+00> : vector<1x64xf32>
    %38 = tpu.matmul %36, %37, %cst_11 {dimension_numbers = #tpu.dot_dimension_numbers<[1], [1], [0], [0], [0, 0, 1, 0], [], []>} : vector<1x16xf32>, vector<64x16xf32>, vector<1x64xf32> -> vector<1x64xf32>
    %c0_12 = arith.constant 0 : index
    %c0_13 = arith.constant 0 : index
    %39 = vector.load %arg3[%c0_12, %c0_13] : memref<64x64xbf16, #tpu.memory_space<vmem>>, vector<64x64xbf16>
    %40 = arith.extf %39 : vector<64x64xbf16> to vector<64x64xf32>
    %cst_14 = arith.constant 0.000000e+00 : f32
    %41 = vector.broadcast %cst_14 : f32 to vector<64x64xf32>
    %42 = arith.cmpf ogt, %40, %41 : vector<64x64xf32>
    %43 = vector.broadcast %35 : vector<64x1xf32> to vector<64x64xf32>
    %44 = vector.broadcast %38 : vector<1x64xf32> to vector<64x64xf32>
    %45 = arith.addf %43, %44 : vector<64x64xf32>
    %cst_15 = arith.constant 0.000000e+00 : f32
    %46 = vector.broadcast %cst_15 : f32 to vector<64x64xf32>
    %47 = arith.cmpf ogt, %45, %46 : vector<64x64xf32>
    %cst_16 = arith.constant 2.000000e-01 : f32
    %48 = vector.broadcast %cst_16 : f32 to vector<64x64xf32>
    %49 = arith.mulf %48, %45 : vector<64x64xf32>
    %50 = arith.select %47, %45, %49 : vector<64x64xi1>, vector<64x64xf32>
    %cst_17 = arith.constant -1.000000e+30 : f32
    %51 = vector.broadcast %cst_17 : f32 to vector<64x64xf32>
    %52 = arith.select %42, %50, %51 : vector<64x64xi1>, vector<64x64xf32>
    %cst_18 = arith.constant dense<0xFF800000> : vector<64xf32>
    %53 = vector.multi_reduction <maximumf>, %52, %cst_18 [1] : vector<64x64xf32> to vector<64xf32>
    %54 = vector.shape_cast %53 : vector<64xf32> to vector<64x1xf32>
    %55 = vector.broadcast %54 : vector<64x1xf32> to vector<64x64xf32>
    %56 = arith.subf %52, %55 : vector<64x64xf32>
    %57 = math.exp %56 : vector<64x64xf32>
    %cst_19 = arith.constant dense<0.000000e+00> : vector<64xf32>
    %58 = vector.multi_reduction <add>, %57, %cst_19 [1] : vector<64x64xf32> to vector<64xf32>
    %59 = vector.shape_cast %58 : vector<64xf32> to vector<64x1xf32>
    %60 = tpu.reciprocal %59 {approx = true} : vector<64x1xf32> -> vector<64x1xf32>
    %61 = arith.mulf %59, %60 : vector<64x1xf32>
    %cst_20 = arith.constant 2.000000e+00 : f32
    %62 = vector.broadcast %cst_20 : f32 to vector<64x1xf32>
    %63 = arith.subf %62, %61 : vector<64x1xf32>
    %64 = arith.mulf %60, %63 : vector<64x1xf32>
    %cst_21 = arith.constant dense<0.000000e+00> : vector<64x16xf32>
    %65 = tpu.matmul %57, %32, %cst_21 {dimension_numbers = #tpu.dot_dimension_numbers<[1], [0], [0], [1], [0, 0, 1, 1], [], []>} : vector<64x64xf32>, vector<64x16xf32>, vector<64x16xf32> -> vector<64x16xf32>
    %66 = vector.broadcast %64 : vector<64x1xf32> to vector<64x16xf32>
    %67 = arith.mulf %65, %66 : vector<64x16xf32>
    %cst_22 = arith.constant 0.000000e+00 : f32
    %68 = vector.broadcast %cst_22 : f32 to vector<64x16xf32>
    %69 = arith.cmpf ogt, %67, %68 : vector<64x16xf32>
    %70 = math.exp %67 : vector<64x16xf32>
    %cst_23 = arith.constant 1.000000e+00 : f32
    %71 = vector.broadcast %cst_23 : f32 to vector<64x16xf32>
    %72 = arith.subf %70, %71 : vector<64x16xf32>
    %73 = arith.select %69, %67, %72 : vector<64x16xi1>, vector<64x16xf32>
    %c0_24 = arith.constant 0 : index
    %c0_25 = arith.constant 0 : index
    %74 = vector.load %arg4[%c0_24, %c0_25] : memref<64x16xf32, #tpu.memory_space<vmem>>, vector<64x16xf32>
    tpu.vector_store %arg4[%c0_24, %c0_25], %73 {strides = array<i32>} : memref<64x16xf32, #tpu.memory_space<vmem>>, vector<64x16xf32>,
    return
  }
}

</mosaic_0001>

<bundles_post_ra>
// kernel: meta_gnn_forward.1
= control target key start
LH: loop header
LB: loop body
LE: loop exit
PB: predicated region body
PF: predicated region fallthrough
CT: control target
= control target key end

     0   :  { %vm27_vm0 = vcmask 130048   ;;  %v311_v0 = vlaneseq  ;;  %v1605_v14 = vmov 1.0   ;;  %vm402_vm4 = vcmask 64512   ;;  %s2051_s1 = inlined_call_operand.vmem [shape: f32[16,32], index: 1, kind: input, shape index: {}]   ;;  %s2052_s0 = inlined_call_operand.vmem [shape: f32[64,16], index: 0, kind: input, shape index: {}]   ;;  %s2053_s2 = inlined_call_operand.vmem [shape: f32[32,160], index: 2, kind: input, shape index: {}]   ;;  %s2054_s3 = inlined_call_operand.vmem [shape: bf16[64,64], index: 3, kind: input, shape index: {}]   ;;  %s2055_s4 = inlined_call_operand.vmem [shape: f32[64,16], index: 4, kind: output, shape index: {}]  }
   0x1   :  { %v25_v1 = vld [vmem:[%s2051_s1] sm:$0xff]  ;;  %v26_v2 = vld [vmem:[%s2051_s1 + $0x8] sm:$0xff]  ;;  %v19_v10 = vld [vmem:[%s2052_s0 + $0x10] sm:$0xff]  ;;  %v1606_v29 = vmov 0.0   ;;  %v1607_v36 = vmov 1.0|1.0  }
   0x2   :  { %v17_v3 = vld [vmem:[%s2052_s0] sm:$0xff]  ;;  %v1459_v4 = vpack.c.bf16 %v26_v2, %v25_v1  ;;  %v1646_v5 = vshrl.u32 %v311_v0, 7  ;;  %v1648_v6 = vand.u32 127, %v311_v0  ;;  %v18_v9 = vld [vmem:[%s2052_s0 + $0x8] sm:$0xff]  ;;  %v20_v12 = vld [vmem:[%s2052_s0 + $0x18] sm:$0xff]  ;;  %262 = vmatprep.mubr.f32.mxu1 %v1606_v29  ;;  %vm173_vm10 = vcmask 261120  }
   0x3   :  { %1342 = vmatprep.mubr.msk.f32.mxu0 %vm27_vm0, %v17_v3  ;;  %v21_v13 = vld [vmem:[%s2052_s0 + $0x20] sm:$0xff]  ;;  %v22_v15 = vld [vmem:[%s2052_s0 + $0x28] sm:$0xff]  ;;  %v23_v16 = vld [vmem:[%s2052_s0 + $0x30] sm:$0xff] }
   0x4   :  { %1460 = vmatprep.subr.bf16.mxu0 %v1459_v4  ;;  %v315_v7 = vmul.u32 16, %v1646_v5  ;;  %v317_v8 = vadd.s32 1, %v1646_v5  ;;  %v24_v17 = vld [vmem:[%s2052_s0 + $0x38] sm:$0xff]  ;;  %v166_v18 = vld [vmem:[%s2053_s2 + $0x8] sm:$0xff]  ;;  %v165_v20 = vld [vmem:[%s2053_s2] sm:$0xff]  ;;  %v323_v31 = vadd.s32 8, %v1646_v5 }
   0x5   :  { %1462 = vmatpush3.bf16.msra.mxu0 %v1459_v4  ;;  %v168_v19 = vld [vmem:[%s2053_s2 + $0x18] sm:$0xff]  ;;  %v167_v22 = vld [vmem:[%s2053_s2 + $0x10] sm:$0xff]  ;;  %v170_v24 = vld [vmem:[%s2053_s2 + $0x28] sm:$0xff]  ;;  %v338_v32 = vand.u32 15, %v1646_v5  ;;  %v324_v39 = vadd.s32 16, %v1646_v5  ;;  %v325_v40 = vadd.s32 24, %v1646_v5 }
   0x6   :  { %vm316_vm1 = vcmp.ge.s32.totalorder %v1648_v6, %v315_v7  ;;  %v318_v11 = vmul.u32 16, %v317_v8  ;;  %v1463_v21 = vpack.c.bf16 %v168_v19, %v166_v18  ;;  %v1465_v23 = vpack.c.bf16 %v167_v22, %v165_v20  ;;  %v172_v25 = vld [vmem:[%s2053_s2 + $0x38] sm:$0xff]  ;;  %v169_v26 = vld [vmem:[%s2053_s2 + $0x20] sm:$0xff]  ;;  %v171_v28 = vld [vmem:[%s2053_s2 + $0x30] sm:$0xff]  ;;  %s1608_s2 = smov 112  }
   0x7   :  { %v1467_v27 = vpack.c.bf16 %v172_v25, %v170_v24  ;;  %v1469_v30 = vpack.c.bf16 %v171_v28, %v169_v26  ;;  %v339_v33 = vand.u32 15, %v323_v31  ;;  %vm1712_vm5 = vcmp.eq.s32.totalorder %v338_v32, %v1648_v6 }
   0x8   :  { %1343 = vmatmul.mubr.msk.f32.vlgmr.msra.gmra.mrb[0].mxu0 %vm27_vm0, %v18_v9  ;;  %vm319_vm2 = vcmp.lt.s32.totalorder %v1648_v6, %v318_v11  ;;  %1464 = vmatprep.subr.bf16.mxu1 %v1463_v21  ;;  %v340_v43 = vand.u32 15, %v324_v39  ;;  %v341_v44 = vand.u32 15, %v325_v40  ;;  %v326_v45 = vadd.s32 32, %v1646_v5 }
   0x9   :  { %1345 = vmatprep.mubr.msk.f32.mxu0 %vm27_vm0, %v19_v10  ;;  %vm320_vm3 = vmand %vm316_vm1, %vm319_vm2  ;;  %1466 = vmatpush1.bf16.msra.mxu1 %v1465_v23  ;;  %vm1717_vm6 = vcmp.eq.s32.totalorder %v339_v33, %v1648_v6  ;;  %v327_v46 = vadd.s32 40, %v1646_v5  ;;  %v328_v48 = vadd.s32 48, %v1646_v5  ;;  %v329_v49 = vadd.s32 56, %v1646_v5 }
   0xa   :  { %1354 = vmatprep.subr.msk.mxu0 %vm320_vm3, %v1605_v14  ;;  %1468 = vmatprep.subr.bf16.mxu1 %v1467_v27  ;;  %vm1471_vm7 = vmpackc.low %vm1717_vm6, %vm1712_vm5  ;;  %vm1738_vm8 = vcmp.eq.s32.totalorder %v340_v43, %v1648_v6  ;;  %vm1743_vm9 = vcmp.eq.s32.totalorder %v341_v44, %v1648_v6  ;;  %v342_v53 = vand.u32 15, %v326_v45  ;;  %v330_v62 = vadd.s32 64, %v1646_v5 }
   0xb   :  { %1355 = vmatpush3.msk.msra.mxu0 %vm320_vm3, %v1605_v14  ;;  %v343_v54 = vand.u32 15, %v327_v46  ;;  %vm1475_vm11 = vmpackc.low %vm1743_vm9, %vm1738_vm8  ;;  %v344_v57 = vand.u32 15, %v328_v48  ;;  %v345_v58 = vand.u32 15, %v329_v49  ;;  %v331_v63 = vadd.s32 72, %v1646_v5 }
   0xc   :  { %1346 = vmatmul.mubr.msk.f32.gmra.mrb[2].mxu0 %vm27_vm0, %v20_v12  ;;  %vm1753_vm12 = vcmp.eq.s32.totalorder %v342_v53, %v1648_v6  ;;  %v332_v7 = vadd.s32 80, %v1646_v5  ;;  %v333_v8 = vadd.s32 88, %v1646_v5  ;;  %v335_v11 = vadd.s32 104, %v1646_v5 }
   0xd   :  { %1348 = vmatprep.mubr.msk.f32.mxu0 %vm27_vm0, %v21_v13  ;;  %1470 = vmatpush1.bf16.msra.mxu1 %v1469_v30  ;;  %vm1758_vm13 = vcmp.eq.s32.totalorder %v343_v54, %v1648_v6  ;;  %vm1782_vm15 = vcmp.eq.s32.totalorder %v344_v57, %v1648_v6  ;;  %vm1787_vm1 = vcmp.eq.s32.totalorder %v345_v58, %v1648_v6  ;;  %v347_v4 = vand.u32 15, %v331_v63 }
   0xe   :  { %1472 = vmatprep.subr.msk.bf16.mxu1 %vm1471_vm7, %v1607_v36  ;;  %vm1479_vm14 = vmpackc.low %vm1758_vm13, %vm1753_vm12  ;;  %v351_v21 = vand.u32 15, %v335_v11  ;;  %v336_v28 = vadd.s32 112, %v1646_v5  ;;  %v337_v30 = vadd.s32 120, %v1646_v5  ;;  %v1609_v63 = vmov 0.0|0.0  }
   0xf   :  { %vm1483_vm2 = vmpackc.low %vm1787_vm1, %vm1782_vm15  ;;  %1503 = vmatprep.subr.bf16.mxu0 %v1609_v63 }
  0x10   :  { %1349 = vmatmul.mubr.msk.f32.gmra.mrb[4].mxu0 %vm27_vm0, %v22_v15  ;;  %v352_v31 = vand.u32 15, %v336_v28  ;;  %v353_v32 = vand.u32 15, %v337_v30  ;;  %vm1921_vm1 = vmpackc.low %vm27_vm0, %vm27_vm0 }
  0x11   :  { %1351 = vmatprep.mubr.msk.f32.mxu0 %vm27_vm0, %v23_v16 }
  0x12   :  { %vm368_vm13 = vcmp.eq.s32.totalorder %v352_v31, %v1648_v6 }
  0x14   :  { %1352 = vmatmul.mubr.msk.f32.gmra.mrb[6].mxu0 %vm27_vm0, %v24_v17 }
  0x15   :  { %1356 = vmatprep.mubr.msk.f32.mxu0 %vm402_vm4, %v17_v3  ;;  %v346_v3 = vand.u32 15, %v330_v62 }
  0x17   :  { %vm1815_vm3 = vcmp.eq.s32.totalorder %v346_v3, %v1648_v6 }
  0x18   :  { %1357 = vmatmul.mubr.msk.f32.vlgmr.msra.gmra.mrb[8].mxu0 %vm402_vm4, %v18_v9 }
  0x19   :  { %1359 = vmatprep.mubr.msk.f32.mxu0 %vm402_vm4, %v19_v10  ;;  %v334_v10 = vadd.s32 96, %v1646_v5 }
  0x1b   :  { %v350_v20 = vand.u32 15, %v334_v10 }
  0x1c   :  { %1360 = vmatmul.mubr.msk.f32.gmra.mrb[10].mxu0 %vm402_vm4, %v20_v12 }
  0x1d   :  { %1362 = vmatprep.mubr.msk.f32.mxu0 %vm402_vm4, %v21_v13  ;;  %vm1871_vm9 = vcmp.eq.s32.totalorder %v350_v20, %v1648_v6 }
  0x20   :  { %1363 = vmatmul.mubr.msk.f32.gmra.mrb[12].mxu0 %vm402_vm4, %v22_v15  ;;  %v348_v15 = vand.u32 15, %v332_v7 }
  0x21   :  { %1365 = vmatprep.mubr.msk.f32.mxu0 %vm402_vm4, %v23_v16  ;;  %v349_v16 = vand.u32 15, %v333_v8 }
  0x22   :  { %vm1843_vm6 = vcmp.eq.s32.totalorder %v348_v15, %v1648_v6 }
  0x24   :  { %1366 = vmatmul.mubr.msk.f32.gmra.mrb[14].mxu0 %vm402_vm4, %v24_v17  ;;  %vm1820_vm4 = vcmp.eq.s32.totalorder %v347_v4, %v1648_v6 }
  0x25   :  { %vm1487_vm5 = vmpackc.low %vm1820_vm4, %vm1815_vm3  ;;  %vm874_vm3 = vcmask 523264  }
  0xdb   :  { %v1344_v37 = vpop.f32.mrb[0].mxu0 }
  0xdc   :  { %v118_v38 = vpop.f32.mrb[1].mxu0 }
  0xdd   :  { %1541 = vtanh.f32 %v118_v38 }
  0xde   :  { %1543 = vtanh.f32 %v1344_v37 }
  0xdf   :  { %v1347_v41 = vpop.f32.mrb[2].mxu0 }
  0xe0   :  { %v128_v42 = vpop.f32.mrb[3].mxu0 }
  0xe1   :  { %1545 = vtanh.f32 %v128_v42 }
  0xe2   :  { %1547 = vtanh.f32 %v1347_v41 }
  0xe3   :  { %v1350_v47 = vpop.f32.mrb[4].mxu0 }
  0xe4   :  { %v138_v50 = vpop.f32.mrb[5].mxu0 }
  0xe5   :  { %1549 = vtanh.f32 %v138_v50 }
  0xe6   :  { %1551 = vtanh.f32 %v1350_v47 }
  0xe7   :  { %v1542_v55 = vpop.eup %1541  ;;  %v1353_v56 = vpop.f32.mrb[6].mxu0 }
  0xe8   :  { %1176 = vmatmul.mubr.msk.f32.vlgmr.msra.gmra.mrb[0].mxu1 %vm173_vm10, %v1542_v55  ;;  %v148_v59 = vpop.f32.mrb[7].mxu0  ;;  %v1544_v0 = vpop.eup %1543 }
  0xe9   :  { %268 = vmatprep.mubr.f32.mxu1 %v1606_v29  ;;  %1474 = vmatpush3.bf16.msk.msra.mxu1 %vm1471_vm7, %v1607_v36  ;;  %1553 = vtanh.f32 %v148_v59  ;;  %vm1848_vm7 = vcmp.eq.s32.totalorder %v349_v16, %v1648_v6 }
  0xea   :  { %1476 = vmatprep.subr.msk.bf16.mxu1 %vm1475_vm11, %v1607_v36  ;;  %vm1491_vm8 = vmpackc.low %vm1848_vm7, %vm1843_vm6  ;;  %1555 = vtanh.f32 %v1353_v56 }
  0xeb   :  { %v1546_v9 = vpop.eup %1545  ;;  %v1358_v27 = vpop.f32.mrb[8].mxu0 }
  0xec   :  { %1177 = vmatmul.mubr.msk.f32.gmra.mrb[2].mxu1 %vm173_vm10, %v1544_v0  ;;  %v1548_v17 = vpop.eup %1547  ;;  %v485_v33 = vpop.f32.mrb[9].mxu0 }
  0xed   :  { %274 = vmatprep.mubr.f32.mxu1 %v1606_v29  ;;  %1478 = vmatpush3.bf16.msk.msra.mxu1 %vm1475_vm11, %v1607_v36  ;;  %vm367_vm11 = vcmp.eq.s32.totalorder %v351_v21, %v1648_v6 }
  0xee   :  { %1480 = vmatprep.subr.msk.bf16.mxu1 %vm1479_vm14, %v1607_v36  ;;  %vm1495_vm12 = vmpackc.low %vm367_vm11, %vm1871_vm9 }
  0xef   :  { %v1550_v22 = vpop.eup %1549  ;;  %v1361_v34 = vpop.f32.mrb[10].mxu0 }
  0xf0   :  { %1178 = vmatmul.mubr.msk.f32.gmra.mrb[4].mxu1 %vm173_vm10, %v1546_v9  ;;  %v1552_v24 = vpop.eup %1551  ;;  %v495_v35 = vpop.f32.mrb[11].mxu0 }
  0xf1   :  { %280 = vmatprep.mubr.f32.mxu1 %v1606_v29  ;;  %1482 = vmatpush3.bf16.msk.msra.mxu1 %vm1479_vm14, %v1607_v36  ;;  %vm369_vm14 = vcmp.eq.s32.totalorder %v353_v32, %v1648_v6 }
  0xf2   :  { %1484 = vmatprep.subr.msk.bf16.mxu1 %vm1483_vm2, %v1607_v36  ;;  %vm1499_vm15 = vmpackc.low %vm369_vm14, %vm368_vm13 }
  0xf3   :  { %v1554_v25 = vpop.eup %1553  ;;  %v1364_v37 = vpop.f32.mrb[12].mxu0 }
  0xf4   :  { %1179 = vmatmul.mubr.msk.f32.gmra.mrb[6].mxu1 %vm173_vm10, %v1548_v17  ;;  %v1556_v26 = vpop.eup %1555  ;;  %v505_v38 = vpop.f32.mrb[13].mxu0 }
  0xf5   :  { %286 = vmatprep.mubr.f32.mxu1 %v1606_v29  ;;  %1486 = vmatpush3.bf16.msk.msra.mxu1 %vm1483_vm2, %v1607_v36 }
  0xf6   :  { %1488 = vmatprep.subr.msk.bf16.mxu1 %vm1487_vm5, %v1607_v36 }
  0xf7   :  { %v1367_v39 = vpop.f32.mrb[14].mxu0 }
  0xf8   :  { %1180 = vmatmul.mubr.msk.f32.gmra.mrb[8].mxu1 %vm173_vm10, %v1550_v22  ;;  %v515_v40 = vpop.f32.mrb[15].mxu0 }
  0xf9   :  { %292 = vmatprep.mubr.f32.mxu1 %v1606_v29  ;;  %1490 = vmatpush3.bf16.msk.msra.mxu1 %vm1487_vm5, %v1607_v36 }
  0xfa   :  { %1492 = vmatprep.subr.msk.bf16.mxu1 %vm1491_vm8, %v1607_v36 }
  0xfc   :  { %1181 = vmatmul.mubr.msk.f32.gmra.mrb[10].mxu1 %vm173_vm10, %v1552_v24 }
  0xfd   :  { %298 = vmatprep.mubr.f32.mxu1 %v1606_v29  ;;  %1494 = vmatpush3.bf16.msk.msra.mxu1 %vm1491_vm8, %v1607_v36 }
  0xfe   :  { %1496 = vmatprep.subr.msk.bf16.mxu1 %vm1495_vm12, %v1607_v36 }
 0x100   :  { %1182 = vmatmul.mubr.msk.f32.gmra.mrb[12].mxu1 %vm173_vm10, %v1554_v25 }
 0x101   :  { %304 = vmatprep.mubr.f32.mxu1 %v1606_v29  ;;  %1498 = vmatpush3.bf16.msk.msra.mxu1 %vm1495_vm12, %v1607_v36 }
 0x102   :  { %1500 = vmatprep.subr.msk.bf16.mxu1 %vm1499_vm15, %v1607_v36 }
 0x104   :  { %1183 = vmatmul.mubr.msk.f32.gmra.mrb[14].mxu1 %vm173_vm10, %v1556_v26  ;;  %vm1610_vm10 = vmmov 0  }
 0x105   :  { %1502 = vmatpush3.bf16.msk.msra.mxu1 %vm1499_vm15, %v1607_v36  ;;  %1428 = vmatprep.mubr.msk.f32.mxu0 %vm1610_vm10, %v1606_v29 }
 0x1bb   :  { %v264_v41 = vpop.f32.mrb[0].mxu1 }
 0x1bc   :  { %v524_v42 = vmul.f32 %v485_v33, %v264_v41  ;;  %v266_v43 = vpop.f32.mrb[1].mxu1 }
 0x1bd   :  { %677 = vrot.lane.b32.xlu0 %v266_v43, %s1608_s2 }
 0x1be   :  { %1400 = vmatprep.mubr.f32.mxu1 %v524_v42 }
 0x1bf   :  { %v270_v44 = vpop.f32.mrb[2].mxu1 }
 0x1c0   :  { %v525_v6 = vmul.f32 %v1358_v27, %v270_v44  ;;  %v272_v45 = vpop.f32.mrb[3].mxu1 }
 0x1c1   :  { %679 = vrot.lane.b32.xlu0 %v272_v45, %s1608_s2 }
 0x1c2   :  { %1401 = vmatmul.mubr.f32.vlgmr.msra.gmra.mrb[16].mxu1 %v525_v6 }
 0x1c3   :  { %v276_v36 = vpop.f32.mrb[4].mxu1 }
 0x1c4   :  { %v526_v46 = vmul.f32 %v495_v35, %v276_v36  ;;  %v278_v47 = vpop.f32.mrb[5].mxu1 }
 0x1c5   :  { %681 = vrot.lane.b32.xlu1 %v278_v47, %s1608_s2 }
 0x1c6   :  { %1403 = vmatprep.mubr.f32.mxu1 %v526_v46 }
 0x1c7   :  { %v282_v48 = vpop.f32.mrb[6].mxu1 }
 0x1c8   :  { %v527_v49 = vmul.f32 %v1361_v34, %v282_v48  ;;  %v284_v50 = vpop.f32.mrb[7].mxu1 }
 0x1c9   :  { %683 = vrot.lane.b32.xlu1 %v284_v50, %s1608_s2 }
 0x1ca   :  { %1404 = vmatmul.mubr.f32.gmra.mrb[18].mxu1 %v527_v49 }
 0x1cb   :  { %v288_v51 = vpop.f32.mrb[8].mxu1 }
 0x1cc   :  { %v528_v52 = vmul.f32 %v505_v38, %v288_v51  ;;  %v1904_v53 = vpop.f32.mrb[9].mxu1 }
 0x1cd   :  { %685 = vrot.lane.b32.xlu0 %v1904_v53, %s1608_s2 }
 0x1ce   :  { %1406 = vmatprep.mubr.f32.mxu1 %v528_v52 }
 0x1cf   :  { %v294_v54 = vpop.f32.mrb[10].mxu1 }
 0x1d0   :  { %v529_v55 = vmul.f32 %v1364_v37, %v294_v54  ;;  %v296_v56 = vpop.f32.mrb[11].mxu1  ;;  %v1252_v54 = vld [vmem:[%s2054_s3] sm:$0xff]  }
 0x1d1   :  { %687 = vrot.lane.b32.xlu1 %v296_v56, %s1608_s2 }
 0x1d2   :  { %1407 = vmatmul.mubr.f32.gmra.mrb[20].mxu1 %v529_v55 }
 0x1d3   :  { %v300_v57 = vpop.f32.mrb[12].mxu1 }
 0x1d4   :  { %v530_v58 = vmul.f32 %v515_v40, %v300_v57  ;;  %v1909_v59 = vpop.f32.mrb[13].mxu1  ;;  %v832_v57 = vsub.s32 0, %v1646_v5 }
 0x1d5   :  { %689 = vrot.lane.b32.xlu0 %v1909_v59, %s1608_s2 }
 0x1d6   :  { %1409 = vmatprep.mubr.f32.mxu1 %v530_v58  ;;  %v1254_v58 = vunpack.c.h.bf16 %v1252_v54 }
 0x1d7   :  { %v306_v60 = vpop.f32.mrb[14].mxu1 }
 0x1d8   :  { %v531_v61 = vmul.f32 %v1367_v39, %v306_v60  ;;  %v1913_v62 = vpop.f32.mrb[15].mxu1  ;;  %vm1955_vm2 = vcmp.gt.f32.partialorder %v1254_v58, 0.0 }
 0x1d9   :  { %691 = vrot.lane.b32.xlu1 %v1913_v62, %s1608_s2 }
 0x1da   :  { %1410 = vmatmul.mubr.f32.gmra.mrb[22].mxu1 %v531_v61 }
 0x22f   :  { %v678_v0 = vpop.permute.xlu0 %677 }
 0x233   :  { %v680_v1 = vpop.permute.xlu0 %679 }
 0x237   :  { %v682_v8 = vpop.permute.xlu1 %681 }
 0x23b   :  { %v684_v16 = vpop.permute.xlu1 %683 }
 0x23f   :  { %v686_v30 = vpop.permute.xlu0 %685 }
 0x243   :  { %v688_v26 = vpop.permute.xlu1 %687 }
 0x24b   :  { %v692_v41 = vpop.permute.xlu1 %691 }
 0x295   :  { %v1402_v2 = vpop.f32.mrb[16].mxu1 }
 0x296   :  { %v702_v3 = vmul.f32 %v1402_v2, %v680_v1  ;;  %v598_v4 = vpop.f32.mrb[17].mxu1  ;;  %v638_v7 = vmul.f32 %v1402_v2, %v272_v45 }
 0x297   :  { %v701_v9 = vmul.f32 %v678_v0, %v598_v4  ;;  %v1519_v10 = vpack.c.bf16 %v1402_v2, %v598_v4  ;;  %v637_v11 = vmul.f32 %v598_v4, %v266_v43  ;;  %v690_v43 = vpop.permute.xlu0 %689 }
 0x298   :  { %v648_v12 = vsel %vm27_vm0, %v638_v7, 0.0 }
 0x299   :  { %v1504_v15 = vpack.c.bf16 %v702_v3, %v701_v9  ;;  %649 = vadd.xlane.f32.xlu1 %v648_v12  ;;  %1520 = vmatprep.subr.bf16.mxu1 %v1519_v10  ;;  %v645_v29 = vsel %vm27_vm0, %v637_v11, 0.0 }
 0x29a   :  { %1522 = vmatpush3.bf16.msra.mxu1 %v1519_v10  ;;  %646 = vadd.xlane.f32.xlu0 %v645_v29 }
 0x29b   :  { %1506 = vmatpush3.bf16.xpose.msk.msra.mxu0 %vm1921_vm1, %v1504_v15 }
 0x29c   :  { %1507 = vmatprep.subr.bf16.mxu0 %v1609_v63 }
 0x29d   :  { %v1405_v17 = vpop.f32.mrb[18].mxu1 }
 0x29e   :  { %v704_v18 = vmul.f32 %v1405_v17, %v684_v16  ;;  %v608_v19 = vpop.f32.mrb[19].mxu1  ;;  %v640_v20 = vmul.f32 %v1405_v17, %v284_v50 }
 0x29f   :  { %v703_v21 = vmul.f32 %v682_v8, %v608_v19  ;;  %v1523_v22 = vpack.c.bf16 %v1405_v17, %v608_v19  ;;  %v639_v23 = vmul.f32 %v608_v19, %v278_v47 }
 0x2a0   :  { %v654_v28 = vsel %vm27_vm0, %v640_v20, 0.0 }
 0x2a1   :  { %v1508_v24 = vpack.c.bf16 %v704_v18, %v703_v21  ;;  %1524 = vmatprep.subr.bf16.mxu1 %v1523_v22  ;;  %v651_v25 = vsel %vm27_vm0, %v639_v23, 0.0 }
 0x2a2   :  { %1526 = vmatpush3.bf16.msra.mxu1 %v1523_v22  ;;  %652 = vadd.xlane.f32.xlu0 %v651_v25 }
 0x2a3   :  { %1510 = vmatpush3.bf16.xpose.msk.msra.mxu0 %vm1921_vm1, %v1508_v24 }
 0x2a4   :  { %1511 = vmatprep.subr.bf16.mxu0 %v1609_v63 }
 0x2a5   :  { %v1408_v27 = vpop.f32.mrb[20].mxu1 }
 0x2a6   :  { %v706_v31 = vmul.f32 %v1408_v27, %v688_v26  ;;  %655 = vadd.xlane.f32.xlu0 %v654_v28  ;;  %v618_v32 = vpop.f32.mrb[21].mxu1  ;;  %v642_v33 = vmul.f32 %v1408_v27, %v296_v56  ;;  %v1267_v56 = vld [vmem:[%s2054_s3 + $0x8] sm:$0xff]  }
 0x2a7   :  { %v705_v34 = vmul.f32 %v686_v30, %v618_v32  ;;  %v1527_v35 = vpack.c.bf16 %v1408_v27, %v618_v32  ;;  %v641_v37 = vmul.f32 %v618_v32, %v1904_v53  ;;  %v1258_v60 = vunpack.c.h.bf16 %v1267_v56  ;;  %v1269_v32 = vld [vmem:[%s2054_s3 + $0x18] sm:$0xff]  }
 0x2a8   :  { %v660_v38 = vsel %vm27_vm0, %v642_v33, 0.0  ;;  %v1257_v61 = vunpack.c.l.bf16 %v1267_v56 }
 0x2a9   :  { %v1512_v39 = vpack.c.bf16 %v706_v31, %v705_v34  ;;  %1528 = vmatprep.subr.bf16.mxu1 %v1527_v35  ;;  %v657_v40 = vsel %vm27_vm0, %v641_v37, 0.0  ;;  %vm1963_vm5 = vcmp.gt.f32.partialorder %v1258_v60, 0.0 }
 0x2aa   :  { %661 = vadd.xlane.f32.xlu0 %v660_v38  ;;  %1530 = vmatpush3.bf16.msra.mxu1 %v1527_v35  ;;  %vm1967_vm6 = vcmp.gt.f32.partialorder %v1257_v61, 0.0 }
 0x2ab   :  { %658 = vadd.xlane.f32.xlu1 %v657_v40  ;;  %1514 = vmatpush3.bf16.xpose.msk.msra.mxu0 %vm1921_vm1, %v1512_v39 }
 0x2ac   :  { %1515 = vmatprep.subr.bf16.mxu0 %v1609_v63 }
 0x2ad   :  { %v1411_v42 = vpop.f32.mrb[22].mxu1 }
 0x2ae   :  { %v708_v44 = vmul.f32 %v1411_v42, %v692_v41  ;;  %v628_v6 = vpop.f32.mrb[23].mxu1  ;;  %v644_v45 = vmul.f32 %v1411_v42, %v1913_v62 }
 0x2af   :  { %v707_v36 = vmul.f32 %v690_v43, %v628_v6  ;;  %v1531_v46 = vpack.c.bf16 %v1411_v42, %v628_v6  ;;  %v643_v47 = vmul.f32 %v628_v6, %v1909_v59  ;;  %v1253_v59 = vunpack.c.l.bf16 %v1252_v54 }
 0x2b0   :  { %v666_v48 = vsel %vm27_vm0, %v644_v45, 0.0  ;;  %v1266_v42 = vunpack.c.h.bf16 %v1269_v32  ;;  %v1265_v43 = vunpack.c.l.bf16 %v1269_v32 }
 0x2b1   :  { %v1516_v49 = vpack.c.bf16 %v708_v44, %v707_v36  ;;  %667 = vadd.xlane.f32.xlu0 %v666_v48  ;;  %1532 = vmatprep.subr.bf16.mxu1 %v1531_v46  ;;  %v663_v50 = vsel %vm27_vm0, %v643_v47, 0.0  ;;  %vm1959_vm4 = vcmp.gt.f32.partialorder %v1253_v59, 0.0 }
 0x2b2   :  { %1534 = vmatpush3.bf16.msra.mxu1 %v1531_v46  ;;  %664 = vadd.xlane.f32.xlu1 %v663_v50 }
 0x2b3   :  { %1518 = vmatpush3.bf16.xpose.msk.msra.mxu0 %vm1921_vm1, %v1516_v49 }
 0x2ba   :  { %1429 = vmatmul.mubr.msk.f32.vlgmr.msra.gmra.mrb[16].mxu0 %vm27_vm0, %v1605_v14  ;;  %v1268_v14 = vld [vmem:[%s2054_s3 + $0x10] sm:$0xff]  }
 0x2bb   :  { %v1262_v4 = vunpack.c.h.bf16 %v1268_v14  ;;  %v1261_v9 = vunpack.c.l.bf16 %v1268_v14 }
 0x2bd   :  { %vm1980_vm13 = vcmp.gt.f32.partialorder %v1262_v4, 0.0  ;;  %vm1988_vm14 = vcmp.gt.f32.partialorder %v1261_v9, 0.0 }
 0x326   :  { %v650_v55 = vpop.xlane.xlu1 %649 }
 0x327   :  { %v647_v51 = vpop.xlane.xlu0 %646 }
 0x32f   :  { %v653_v52 = vpop.xlane.xlu0 %652 }
 0x333   :  { %v656_v53 = vpop.xlane.xlu0 %655 }
 0x337   :  { %v662_v62 = vpop.xlane.xlu0 %661 }
 0x338   :  { %v659_v63 = vpop.xlane.xlu1 %658 }
 0x33e   :  { %v668_v10 = vpop.xlane.xlu0 %667 }
 0x33f   :  { %v665_v11 = vpop.xlane.xlu1 %664 }
 0x38d   :  { %v802_v0 = vpop.f32.mrb[16].mxu0 }
 0x38e   :  { %v833_v1 = vrot.slane %v802_v0, %v832_v57  ;;  %v1430_v2 = vpop.f32.mrb[17].mxu0 }
 0x390   :  { %v835_v12 = vadd.f32 %v833_v1, %v650_v55  ;;  %v834_v13 = vadd.f32 %v833_v1, %v647_v51  ;;  %v837_v15 = vadd.f32 %v833_v1, %v656_v53  ;;  %v836_v29 = vadd.f32 %v833_v1, %v653_v52 }
 0x391   :  { %v839_v16 = vadd.f32 %v833_v1, %v662_v62  ;;  %v838_v17 = vadd.f32 %v833_v1, %v659_v63  ;;  %v841_v18 = vadd.f32 %v833_v1, %v668_v10  ;;  %v840_v19 = vadd.f32 %v833_v1, %v665_v11 }
 0x392   :  { %vm843_vm7 = vcmp.gt.f32.partialorder %v835_v12, 0.0  ;;  %v851_v20 = vmul.f32 0.2, %v835_v12  ;;  %vm842_vm8 = vcmp.gt.f32.partialorder %v834_v13, 0.0  ;;  %v850_v21 = vmul.f32 0.2, %v834_v13 }
 0x393   :  { %vm845_vm9 = vcmp.gt.f32.partialorder %v837_v15, 0.0  ;;  %v853_v22 = vmul.f32 0.2, %v837_v15  ;;  %vm844_vm11 = vcmp.gt.f32.partialorder %v836_v29, 0.0  ;;  %v852_v23 = vmul.f32 0.2, %v836_v29 }
 0x394   :  { %v859_v24 = vsel %vm843_vm7, %v835_v12, %v851_v20  ;;  %v858_v25 = vsel %vm842_vm8, %v834_v13, %v850_v21  ;;  %vm847_vm12 = vcmp.gt.f32.partialorder %v839_v16, 0.0  ;;  %v855_v26 = vmul.f32 0.2, %v839_v16 }
 0x395   :  { %v867_v27 = vsel %vm1955_vm2, %v859_v24, -1e+30  ;;  %v866_v28 = vsel %vm1959_vm4, %v858_v25, -1e+30  ;;  %v861_v30 = vsel %vm845_vm9, %v837_v15, %v853_v22  ;;  %v860_v31 = vsel %vm844_vm11, %v836_v29, %v852_v23 }
 0x396   :  { %v878_v33 = vsel %vm874_vm3, %v867_v27, -inf  ;;  %v875_v34 = vsel %vm874_vm3, %v866_v28, -inf  ;;  %v869_v37 = vsel %vm1963_vm5, %v861_v30, -1e+30  ;;  %v868_v38 = vsel %vm1967_vm6, %v860_v31, -1e+30 }
 0x397   :  { %879 = vmax.xlane.f32.xlu0 %v878_v33  ;;  %876 = vmax.xlane.f32.xlu1 %v875_v34  ;;  %vm846_vm15 = vcmp.gt.f32.partialorder %v838_v17, 0.0  ;;  %v863_v40 = vsel %vm847_vm12, %v839_v16, %v855_v26  ;;  %v854_v41 = vmul.f32 0.2, %v838_v17  ;;  %vm849_vm10 = vcmp.gt.f32.partialorder %v841_v18, 0.0 }
 0x398   :  { %v857_v44 = vmul.f32 0.2, %v841_v18  ;;  %vm848_vm1 = vcmp.gt.f32.partialorder %v840_v19, 0.0  ;;  %v856_v6 = vmul.f32 0.2, %v840_v19  ;;  %v884_v45 = vsel %vm874_vm3, %v869_v37, -inf }
 0x399   :  { %v881_v36 = vsel %vm874_vm3, %v868_v38, -inf  ;;  %v862_v46 = vsel %vm846_vm15, %v838_v17, %v854_v41  ;;  %v871_v47 = vsel %vm1980_vm13, %v863_v40, -1e+30  ;;  %vm829_vm2 = vcmp.gt.f32.partialorder %v1266_v42, 0.0 }
 0x39a   :  { %v870_v48 = vsel %vm1988_vm14, %v862_v46, -1e+30  ;;  %v865_v49 = vsel %vm849_vm10, %v841_v18, %v857_v44  ;;  %vm828_vm4 = vcmp.gt.f32.partialorder %v1265_v43, 0.0  ;;  %v864_v50 = vsel %vm848_vm1, %v840_v19, %v856_v6 }
 0x39b   :  { %885 = vmax.xlane.f32.xlu0 %v884_v45  ;;  %882 = vmax.xlane.f32.xlu1 %v881_v36  ;;  %v890_v51 = vsel %vm874_vm3, %v871_v47, -inf  ;;  %v887_v52 = vsel %vm874_vm3, %v870_v48, -inf  ;;  %v873_v53 = vsel %vm829_vm2, %v865_v49, -1e+30  ;;  %v872_v54 = vsel %vm828_vm4, %v864_v50, -1e+30 }
 0x39c   :  { %v896_v55 = vsel %vm874_vm3, %v873_v53, -inf  ;;  %v893_v56 = vsel %vm874_vm3, %v872_v54, -inf }
 0x39f   :  { %891 = vmax.xlane.f32.xlu0 %v890_v51  ;;  %888 = vmax.xlane.f32.xlu1 %v887_v52 }
 0x3a3   :  { %897 = vmax.xlane.f32.xlu0 %v896_v55  ;;  %894 = vmax.xlane.f32.xlu1 %v893_v56 }
 0x424   :  { %v880_v57 = vpop.xlane.xlu0 %879  ;;  %v877_v58 = vpop.xlane.xlu1 %876 }
 0x425   :  { %v900_v59 = vsub.f32 %v867_v27, %v880_v57  ;;  %v899_v60 = vsub.f32 %v866_v28, %v877_v58 }
 0x427   :  { %v909_v61 = vmul.f32 1.442695, %v900_v59  ;;  %v907_v14 = vmul.f32 1.442695, %v899_v60 }
 0x428   :  { %v886_v62 = vpop.xlane.xlu0 %885  ;;  %v883_v63 = vpop.xlane.xlu1 %882 }
 0x429   :  { %1557 = vpow2.f32 %v909_v61  ;;  %v902_v0 = vsub.f32 %v869_v37, %v886_v62  ;;  %v901_v1 = vsub.f32 %v868_v38, %v883_v63 }
 0x42a   :  { %1559 = vpow2.f32 %v907_v14 }
 0x42b   :  { %v913_v2 = vmul.f32 1.442695, %v902_v0  ;;  %v911_v3 = vmul.f32 1.442695, %v901_v1 }
 0x42c   :  { %v892_v4 = vpop.xlane.xlu0 %891  ;;  %v889_v5 = vpop.xlane.xlu1 %888 }
 0x42d   :  { %1561 = vpow2.f32 %v913_v2  ;;  %v904_v7 = vsub.f32 %v871_v47, %v892_v4  ;;  %v903_v8 = vsub.f32 %v870_v48, %v889_v5 }
 0x42e   :  { %1563 = vpow2.f32 %v911_v3 }
 0x42f   :  { %v917_v9 = vmul.f32 1.442695, %v904_v7  ;;  %v915_v10 = vmul.f32 1.442695, %v903_v8 }
 0x430   :  { %v898_v11 = vpop.xlane.xlu0 %897  ;;  %v895_v12 = vpop.xlane.xlu1 %894 }
 0x431   :  { %1565 = vpow2.f32 %v917_v9  ;;  %v906_v13 = vsub.f32 %v873_v53, %v898_v11  ;;  %v905_v15 = vsub.f32 %v872_v54, %v895_v12 }
 0x432   :  { %1567 = vpow2.f32 %v915_v10 }
 0x433   :  { %v1558_v29 = vpop.eup %1557  ;;  %v921_v16 = vmul.f32 1.442695, %v906_v13  ;;  %v919_v17 = vmul.f32 1.442695, %v905_v15 }
 0x434   :  { %v1560_v18 = vpop.eup %1559  ;;  %v926_v19 = vsel %vm874_vm3, %v1558_v29, 0.0 }
 0x435   :  { %1569 = vpow2.f32 %v921_v16  ;;  %1447 = vmatprep.mubr.msk.f32.mxu1 %vm874_vm3, %v1560_v18  ;;  %927 = vadd.xlane.f32.xlu0 %v926_v19  ;;  %v923_v20 = vsel %vm874_vm3, %v1560_v18, 0.0 }
 0x436   :  { %1571 = vpow2.f32 %v919_v17  ;;  %1448 = vmatmul.mubr.msk.f32.vlgmr.msra.gmra.mrb[24].mxu1 %vm874_vm3, %v1558_v29  ;;  %924 = vadd.xlane.f32.xlu1 %v923_v20 }
 0x437   :  { %v1562_v21 = vpop.eup %1561 }
 0x438   :  { %v1564_v22 = vpop.eup %1563  ;;  %v932_v23 = vsel %vm874_vm3, %v1562_v21, 0.0 }
 0x439   :  { %1450 = vmatprep.mubr.msk.f32.mxu1 %vm874_vm3, %v1564_v22  ;;  %933 = vadd.xlane.f32.xlu0 %v932_v23  ;;  %v929_v24 = vsel %vm874_vm3, %v1564_v22, 0.0 }
 0x43a   :  { %1451 = vmatmul.mubr.msk.f32.gmra.mrb[26].mxu1 %vm874_vm3, %v1562_v21  ;;  %930 = vadd.xlane.f32.xlu1 %v929_v24 }
 0x43b   :  { %v1566_v25 = vpop.eup %1565 }
 0x43c   :  { %v1568_v26 = vpop.eup %1567  ;;  %v938_v27 = vsel %vm874_vm3, %v1566_v25, 0.0 }
 0x43d   :  { %1453 = vmatprep.mubr.msk.f32.mxu1 %vm874_vm3, %v1568_v26  ;;  %939 = vadd.xlane.f32.xlu0 %v938_v27  ;;  %v935_v28 = vsel %vm874_vm3, %v1568_v26, 0.0 }
 0x43e   :  { %1454 = vmatmul.mubr.msk.f32.gmra.mrb[28].mxu1 %vm874_vm3, %v1566_v25  ;;  %936 = vadd.xlane.f32.xlu1 %v935_v28 }
 0x43f   :  { %v1570_v30 = vpop.eup %1569 }
 0x440   :  { %v1572_v31 = vpop.eup %1571  ;;  %v944_v32 = vsel %vm874_vm3, %v1570_v30, 0.0 }
 0x441   :  { %1456 = vmatprep.mubr.msk.f32.mxu1 %vm874_vm3, %v1572_v31  ;;  %945 = vadd.xlane.f32.xlu0 %v944_v32  ;;  %v941_v33 = vsel %vm874_vm3, %v1572_v31, 0.0 }
 0x442   :  { %1457 = vmatmul.mubr.msk.f32.gmra.mrb[30].mxu1 %vm874_vm3, %v1570_v30  ;;  %942 = vadd.xlane.f32.xlu1 %v941_v33 }
 0x4c2   :  { %v928_v34 = vpop.xlane.xlu0 %927 }
 0x4c3   :  { %v925_v35 = vpop.xlane.xlu1 %924  ;;  %1573 = vrcp.f32 %v928_v34 }
 0x4c4   :  { %1575 = vrcp.f32 %v925_v35 }
 0x4c6   :  { %v934_v37 = vpop.xlane.xlu0 %933 }
 0x4c7   :  { %v931_v38 = vpop.xlane.xlu1 %930  ;;  %1577 = vrcp.f32 %v934_v37 }
 0x4c8   :  { %1579 = vrcp.f32 %v931_v38 }
 0x4ca   :  { %v940_v39 = vpop.xlane.xlu0 %939 }
 0x4cb   :  { %v937_v40 = vpop.xlane.xlu1 %936  ;;  %1581 = vrcp.f32 %v940_v39 }
 0x4cc   :  { %1583 = vrcp.f32 %v937_v40 }
 0x4cd   :  { %v1574_v42 = vpop.eup %1573 }
 0x4ce   :  { %v946_v41 = vpop.xlane.xlu0 %945  ;;  %v1576_v44 = vpop.eup %1575  ;;  %v956_v6 = vmul.f32 %v1574_v42, %v928_v34 }
 0x4cf   :  { %v943_v43 = vpop.xlane.xlu1 %942  ;;  %1585 = vrcp.f32 %v946_v41  ;;  %v955_v36 = vmul.f32 %v1576_v44, %v925_v35 }
 0x4d0   :  { %1587 = vrcp.f32 %v943_v43  ;;  %v964_v47 = vsub.f32 2.0, %v956_v6 }
 0x4d1   :  { %v1578_v45 = vpop.eup %1577  ;;  %v963_v50 = vsub.f32 2.0, %v955_v36 }
 0x4d2   :  { %v1580_v46 = vpop.eup %1579  ;;  %v958_v48 = vmul.f32 %v1578_v45, %v934_v37  ;;  %v972_v55 = vmul.f32 %v1574_v42, %v964_v47 }
 0x4d3   :  { %v957_v51 = vmul.f32 %v1580_v46, %v931_v38  ;;  %v971_v60 = vmul.f32 %v1576_v44, %v963_v50 }
 0x4d4   :  { %v966_v53 = vsub.f32 2.0, %v958_v48 }
 0x4d5   :  { %v1582_v49 = vpop.eup %1581  ;;  %v965_v57 = vsub.f32 2.0, %v957_v51 }
 0x4d6   :  { %v1584_v52 = vpop.eup %1583  ;;  %v960_v54 = vmul.f32 %v1582_v49, %v940_v39  ;;  %v974_v3 = vmul.f32 %v1578_v45, %v966_v53 }
 0x4d7   :  { %v959_v58 = vmul.f32 %v1584_v52, %v937_v40  ;;  %v973_v9 = vmul.f32 %v1580_v46, %v965_v57 }
 0x4d8   :  { %v968_v0 = vsub.f32 2.0, %v960_v54 }
 0x4d9   :  { %v1586_v56 = vpop.eup %1585  ;;  %v967_v4 = vsub.f32 2.0, %v959_v58 }
 0x4da   :  { %v1588_v61 = vpop.eup %1587  ;;  %v962_v1 = vmul.f32 %v1586_v56, %v946_v41  ;;  %v976_v29 = vmul.f32 %v1582_v49, %v968_v0 }
 0x4db   :  { %v961_v5 = vmul.f32 %v1588_v61, %v943_v43  ;;  %v975_v19 = vmul.f32 %v1584_v52, %v967_v4 }
 0x4dc   :  { %v970_v13 = vsub.f32 2.0, %v962_v1 }
 0x4dd   :  { %v969_v16 = vsub.f32 2.0, %v961_v5 }
 0x4de   :  { %v978_v24 = vmul.f32 %v1586_v56, %v970_v13 }
 0x4df   :  { %v977_v27 = vmul.f32 %v1588_v61, %v969_v16 }
 0x509   :  { %v1449_v59 = vpop.f32.mrb[24].mxu1 }
 0x50a   :  { %v1109_v14 = vmul.f32 %v1449_v59, %v972_v55  ;;  %v1069_v62 = vpop.f32.mrb[25].mxu1 }
 0x50b   :  { %v1108_v63 = vmul.f32 %v1069_v62, %v971_v60 }
 0x50c   :  { %v1126_v2 = vmul.f32 1.442695, %v1109_v14  ;;  %vm1117_vm3 = vcmp.gt.f32.partialorder %v1109_v14, 0.0 }
 0x50d   :  { %v1124_v7 = vmul.f32 1.442695, %v1108_v63  ;;  %v1452_v8 = vpop.f32.mrb[26].mxu1  ;;  %vm1116_vm5 = vcmp.gt.f32.partialorder %v1108_v63, 0.0 }
 0x50e   :  { %1589 = vpow2.f32 %v1126_v2  ;;  %v1111_v10 = vmul.f32 %v1452_v8, %v974_v3  ;;  %v1079_v11 = vpop.f32.mrb[27].mxu1 }
 0x50f   :  { %1591 = vpow2.f32 %v1124_v7  ;;  %v1110_v12 = vmul.f32 %v1079_v11, %v973_v9 }
 0x510   :  { %v1130_v15 = vmul.f32 1.442695, %v1111_v10  ;;  %vm1119_vm6 = vcmp.gt.f32.partialorder %v1111_v10, 0.0 }
 0x511   :  { %v1128_v17 = vmul.f32 1.442695, %v1110_v12  ;;  %v1455_v18 = vpop.f32.mrb[28].mxu1  ;;  %vm1118_vm7 = vcmp.gt.f32.partialorder %v1110_v12, 0.0 }
 0x512   :  { %1593 = vpow2.f32 %v1130_v15  ;;  %v1113_v20 = vmul.f32 %v1455_v18, %v976_v29  ;;  %v1089_v21 = vpop.f32.mrb[29].mxu1 }
 0x513   :  { %1595 = vpow2.f32 %v1128_v17  ;;  %v1112_v22 = vmul.f32 %v1089_v21, %v975_v19 }
 0x514   :  { %v1134_v23 = vmul.f32 1.442695, %v1113_v20  ;;  %vm1121_vm8 = vcmp.gt.f32.partialorder %v1113_v20, 0.0 }
 0x515   :  { %v1132_v25 = vmul.f32 1.442695, %v1112_v22  ;;  %v1458_v26 = vpop.f32.mrb[30].mxu1  ;;  %vm1120_vm9 = vcmp.gt.f32.partialorder %v1112_v22, 0.0 }
 0x516   :  { %1597 = vpow2.f32 %v1134_v23  ;;  %v1115_v28 = vmul.f32 %v1458_v26, %v978_v24  ;;  %v1099_v30 = vpop.f32.mrb[31].mxu1 }
 0x517   :  { %1599 = vpow2.f32 %v1132_v25  ;;  %v1114_v31 = vmul.f32 %v1099_v30, %v977_v27 }
 0x518   :  { %v1590_v32 = vpop.eup %1589  ;;  %v1138_v33 = vmul.f32 1.442695, %v1115_v28  ;;  %vm1123_vm11 = vcmp.gt.f32.partialorder %v1115_v28, 0.0 }
 0x519   :  { %v1592_v34 = vpop.eup %1591  ;;  %v1244_v35 = vadd.f32 -1.0, %v1590_v32  ;;  %v1136_v37 = vmul.f32 1.442695, %v1114_v31  ;;  %vm1122_vm12 = vcmp.gt.f32.partialorder %v1114_v31, 0.0 }
 0x51a   :  { %v1243_v38 = vadd.f32 -1.0, %v1592_v34  ;;  %1601 = vpow2.f32 %v1138_v33 }
 0x51b   :  { %v1149_v39 = vsel %vm1117_vm3, %v1109_v14, %v1244_v35  ;;  %1603 = vpow2.f32 %v1136_v37 }
 0x51c   :  { %v1594_v40 = vpop.eup %1593  ;;  %1157 = vst.msk [vmem:[%s2055_s4 + $0x8] sm:$0xff] %vm27_vm0, %v1149_v39  ;;  %v1148_v41 = vsel %vm1116_vm5, %v1108_v63, %v1243_v38 }
 0x51d   :  { %v1596_v42 = vpop.eup %1595  ;;  %1156 = vst.msk [vmem:[%s2055_s4] sm:$0xff] %vm27_vm0, %v1148_v41  ;;  %v1246_v43 = vadd.f32 -1.0, %v1594_v40 }
 0x51e   :  { %v1245_v44 = vadd.f32 -1.0, %v1596_v42 }
 0x51f   :  { %v1151_v6 = vsel %vm1119_vm6, %v1111_v10, %v1246_v43 }
 0x520   :  { %v1598_v45 = vpop.eup %1597  ;;  %1159 = vst.msk [vmem:[%s2055_s4 + $0x18] sm:$0xff] %vm27_vm0, %v1151_v6  ;;  %v1150_v36 = vsel %vm1118_vm7, %v1110_v12, %v1245_v44 }
 0x521   :  { %v1600_v46 = vpop.eup %1599  ;;  %1158 = vst.msk [vmem:[%s2055_s4 + $0x10] sm:$0xff] %vm27_vm0, %v1150_v36  ;;  %v1248_v47 = vadd.f32 -1.0, %v1598_v45 }
 0x522   :  { %v1247_v48 = vadd.f32 -1.0, %v1600_v46 }
 0x523   :  { %v1153_v49 = vsel %vm1121_vm8, %v1113_v20, %v1248_v47 }
 0x524   :  { %v1602_v50 = vpop.eup %1601  ;;  %1161 = vst.msk [vmem:[%s2055_s4 + $0x28] sm:$0xff] %vm27_vm0, %v1153_v49  ;;  %v1152_v51 = vsel %vm1120_vm9, %v1112_v22, %v1247_v48 }
 0x525   :  { %v1604_v52 = vpop.eup %1603  ;;  %1160 = vst.msk [vmem:[%s2055_s4 + $0x20] sm:$0xff] %vm27_vm0, %v1152_v51  ;;  %v1250_v53 = vadd.f32 -1.0, %v1602_v50 }
 0x526   :  { %v1249_v54 = vadd.f32 -1.0, %v1604_v52 }
 0x527   :  { %v1155_v55 = vsel %vm1123_vm11, %v1115_v28, %v1250_v53 }
 0x528   :  { %1163 = vst.msk [vmem:[%s2055_s4 + $0x38] sm:$0xff] %vm27_vm0, %v1155_v55  ;;  %v1154_v56 = vsel %vm1122_vm12, %v1114_v31, %v1249_v54 }
 0x529   :  { %1162 = vst.msk [vmem:[%s2055_s4 + $0x30] sm:$0xff] %vm27_vm0, %v1154_v56 }

</bundles_post_ra>
